<compile_context>
chip_gen: v5e
topology: v5e:2x2
jax: 0.10.0
libtpu: 0.0.40
codegen_flags: <defaults>
</compile_context>

<pallas_src>
import functools

import jax
import jax.numpy as jnp
from jax.experimental import pallas as pl
from jax.experimental.pallas import tpu as pltpu

LANE = 128            # TPU lane width
D_IN, D_HID, D_OUT = 4, 100, 3
NEG_BIG = -1e30       # baked into padded fc3-bias lanes -> exp() == 0 in softmax


def iris_mlp_kernel(x_ref, w1_ref, b1_ref, w2_ref, b2_ref, w3_ref, b3_ref, o_ref):
    # x / weights are bf16, biases fp32; accumulate in fp32 on the MXU.
    x = x_ref[...]                                                            # (TB, 128) bf16

    # fc1 + ReLU
    h1 = jnp.dot(x, w1_ref[...], preferred_element_type=jnp.float32) + b1_ref[...]
    h1 = jnp.maximum(h1, 0.0)                                                 # fp32 (TB, 128)

    # fc2 (no activation, matches the PyTorch forward)
    h2 = jnp.dot(h1.astype(jnp.bfloat16), w2_ref[...],
                 preferred_element_type=jnp.float32) + b2_ref[...]            # fp32 (TB, 128)

    # fc3: padded w3 columns are zero and padded b3 lanes are NEG_BIG, so the 125 padded
    # logit lanes arrive already masked -- no iota/where needed in the kernel.
    logits = jnp.dot(h2.astype(jnp.bfloat16), w3_ref[...],
                     preferred_element_type=jnp.float32) + b3_ref[...]        # fp32 (TB, 128)

    # Numerically stable softmax over dim=1 (fp32), stored as bf16 (halves HBM writeback).
    m = jnp.max(logits, axis=1, keepdims=True)
    e = jnp.exp(logits - m)
    denom = jnp.sum(e, axis=1, keepdims=True)
    o_ref[...] = (e * pl.reciprocal(denom, approx=True)).astype(o_ref.dtype)


def _pad2d(a, rows, cols, dtype):
    out = jnp.zeros((rows, cols), dtype)
    return out.at[: a.shape[0], : a.shape[1]].set(a.astype(dtype))


def init_params(key):
    # Logical nn.Linear params stored transposed as (in, out) so the kernel does x @ W + b.
    k1, k2, k3, k4, k5, k6 = jax.random.split(key, 6)
    w1 = jax.random.normal(k1, (D_IN, D_HID), jnp.float32) * 0.1
    b1 = jax.random.normal(k2, (D_HID,), jnp.float32) * 0.1
    w2 = jax.random.normal(k3, (D_HID, D_HID), jnp.float32) * 0.1
    b2 = jax.random.normal(k4, (D_HID,), jnp.float32) * 0.1
    w3 = jax.random.normal(k5, (D_HID, D_OUT), jnp.float32) * 0.1
    b3 = jax.random.normal(k6, (D_OUT,), jnp.float32) * 0.1
    return (w1, b1, w2, b2, w3, b3)


def prepare_params(params):
    """Host-side one-time padding/casting.

    Weights -> (128, 128) bf16, biases -> (1, 128) fp32.  The fc3 bias carries the softmax
    lane-mask: its padded lanes [D_OUT:] are NEG_BIG so padded logits are pre-masked.
    """
    w1, b1, w2, b2, w3, b3 = params
    w1p = _pad2d(w1, LANE, LANE, jnp.bfloat16)
    w2p = _pad2d(w2, LANE, LANE, jnp.bfloat16)
    w3p = _pad2d(w3, LANE, LANE, jnp.bfloat16)
    b1p = _pad2d(b1.reshape(1, -1), 1, LANE, jnp.float32)
    b2p = _pad2d(b2.reshape(1, -1), 1, LANE, jnp.float32)
    b3p = jnp.full((1, LANE), NEG_BIG, jnp.float32).at[0, :D_OUT].set(b3.astype(jnp.float32))
    return (w1p, b1p, w2p, b2p, w3p, b3p)


def _choose_tile(batch, block_b):
    """Batch tile: multiple of 8 sublanes, large for HBM efficiency, but >= 2 tiles when the
    batch allows it so both v7x TensorCores get work (harmless on v5e/v6e)."""
    pad8 = lambda n: -(-n // 8) * 8
    pb8 = pad8(batch)
    tb = min(block_b, pb8)
    if pb8 // tb < 2 and pb8 >= 16:
        tb = pad8(-(-batch // 2))
    return max(8, tb)


@functools.partial(jax.jit, static_argnames=("block_b",))
def iris_forward(x, padded_params, block_b=512):
    """x: (B, 4) fp32. Returns (B, 3) fp32 softmax probabilities."""
    w1p, b1p, w2p, b2p, w3p, b3p = padded_params
    B = x.shape[0]

    tb = _choose_tile(B, block_b)
    pB = -(-B // tb) * tb

    # Single fused pad (jitted together with the pallas_call): (B,4) f32 -> (pB,128) bf16.
    xp = jnp.pad(x.astype(jnp.bfloat16), ((0, pB - B), (0, LANE - D_IN)))

    out = pl.pallas_call(
        iris_mlp_kernel,
        out_shape=jax.ShapeDtypeStruct((pB, LANE), jnp.bfloat16),
        grid=(pB // tb,),
        in_specs=[
            pl.BlockSpec((tb, LANE), lambda i: (i, 0)),      # x: tiled over batch
            pl.BlockSpec((LANE, LANE), lambda i: (0, 0)),    # w1: resident
            pl.BlockSpec((1, LANE), lambda i: (0, 0)),       # b1
            pl.BlockSpec((LANE, LANE), lambda i: (0, 0)),    # w2
            pl.BlockSpec((1, LANE), lambda i: (0, 0)),       # b2
            pl.BlockSpec((LANE, LANE), lambda i: (0, 0)),    # w3
            pl.BlockSpec((1, LANE), lambda i: (0, 0)),       # b3 (mask baked into padded lanes)
        ],
        out_specs=pl.BlockSpec((tb, LANE), lambda i: (i, 0)),
        compiler_params=pltpu.CompilerParams(
            dimension_semantics=("parallel",)),              # shard batch tiles across TCs (v7x)
    )(xp, w1p, b1p, w2p, b2p, w3p, b3p)

    return out[:B, :D_OUT].astype(jnp.float32)


if __name__ == "__main__":
    key = jax.random.PRNGKey(0)
    pkey, xkey = jax.random.split(key)
    params = init_params(pkey)
    padded_params = prepare_params(params)

    # Small batch; 200 is deliberately not a multiple of the batch tile to exercise padding,
    # and the tile chooser splits it into 2 tiles (both TensorCores on v7x).
    B = 200
    x = jax.random.normal(xkey, (B, D_IN), jnp.float32)

    out = iris_forward(x, padded_params)
    out = jax.block_until_ready(out)
    assert out.shape == (B, D_OUT)

    # Pure-JAX reference mirroring the kernel's bf16-input / fp32-accumulate matmuls.
    w1, b1, w2, b2, w3, b3 = params

    def bf(v):
        return v.astype(jnp.bfloat16).astype(jnp.float32)

    h1 = jnp.maximum(jnp.dot(bf(x), bf(w1)) + b1, 0.0)
    h2 = jnp.dot(bf(h1), bf(w2)) + b2
    logits = jnp.dot(bf(h2), bf(w3)) + b3
    ref = jax.nn.softmax(logits, axis=1)

    # Tolerances account for the bf16 output store and the approx reciprocal in the softmax.
    assert jnp.allclose(out, ref, atol=2e-2), "mismatch vs bf16-matched reference"
    assert jnp.allclose(jnp.sum(out, axis=1), 1.0, atol=2e-2), "softmax rows must sum to ~1"

    print("KERNEL_OK")
</pallas_src>

<mosaic_0001>
module attributes {stable_mosaic.version = 11 : i64} {
  func.func @iris_mlp_kernel(%arg0: i32, %arg1: memref<104x128xbf16, #tpu.memory_space<vmem>>, %arg2: memref<128x128xbf16, #tpu.memory_space<vmem>>, %arg3: memref<1x128xf32, #tpu.memory_space<vmem>>, %arg4: memref<128x128xbf16, #tpu.memory_space<vmem>>, %arg5: memref<1x128xf32, #tpu.memory_space<vmem>>, %arg6: memref<128x128xbf16, #tpu.memory_space<vmem>>, %arg7: memref<1x128xf32, #tpu.memory_space<vmem>>, %arg8: memref<104x128xbf16, #tpu.memory_space<vmem>>) attributes {dimension_semantics = [#tpu.dimension_semantics<parallel>], iteration_bounds = array<i64: 2>, scalar_prefetch = 0 : i64, scratch_operands = 0 : i64, tpu.core_type = #tpu.core_type<tc>, window_params = [{transform_indices = @transform_0, window_bounds = array<i64: 104, 128>}, {pipeline_mode = #tpu.pipeline_mode<synchronous>, transform_indices = @transform_1, window_bounds = array<i64: 128, 128>}, {pipeline_mode = #tpu.pipeline_mode<synchronous>, transform_indices = @transform_2, window_bounds = array<i64: 1, 128>}, {pipeline_mode = #tpu.pipeline_mode<synchronous>, transform_indices = @transform_3, window_bounds = array<i64: 128, 128>}, {pipeline_mode = #tpu.pipeline_mode<synchronous>, transform_indices = @transform_4, window_bounds = array<i64: 1, 128>}, {pipeline_mode = #tpu.pipeline_mode<synchronous>, transform_indices = @transform_5, window_bounds = array<i64: 128, 128>}, {pipeline_mode = #tpu.pipeline_mode<synchronous>, transform_indices = @transform_6, window_bounds = array<i64: 1, 128>}, {transform_indices = @transform_7, window_bounds = array<i64: 104, 128>}]} {
    %c0 = arith.constant 0 : index
    %c0_0 = arith.constant 0 : index
    %0 = vector.load %arg1[%c0, %c0_0] : memref<104x128xbf16, #tpu.memory_space<vmem>>, vector<104x128xbf16>
    %c0_1 = arith.constant 0 : index
    %c0_2 = arith.constant 0 : index
    %1 = vector.load %arg2[%c0_1, %c0_2] : memref<128x128xbf16, #tpu.memory_space<vmem>>, vector<128x128xbf16>
    %cst = arith.constant dense<0.000000e+00> : vector<104x128xf32>
    %2 = tpu.matmul %0, %1, %cst {dimension_numbers = #tpu.dot_dimension_numbers<[1], [0], [0], [1], [0, 0, 1, 1], [], []>} : vector<104x128xbf16>, vector<128x128xbf16>, vector<104x128xf32> -> vector<104x128xf32>
    %c0_3 = arith.constant 0 : index
    %c0_4 = arith.constant 0 : index
    %3 = vector.load %arg3[%c0_3, %c0_4] : memref<1x128xf32, #tpu.memory_space<vmem>>, vector<1x128xf32>
    %4 = vector.broadcast %3 : vector<1x128xf32> to vector<104x128xf32>
    %5 = arith.addf %2, %4 : vector<104x128xf32>
    %cst_5 = arith.constant 0.000000e+00 : f32
    %6 = vector.broadcast %cst_5 : f32 to vector<104x128xf32>
    %7 = arith.maximumf %5, %6 : vector<104x128xf32>
    %8 = arith.truncf %7 : vector<104x128xf32> to vector<104x128xbf16>
    %c0_6 = arith.constant 0 : index
    %c0_7 = arith.constant 0 : index
    %9 = vector.load %arg4[%c0_6, %c0_7] : memref<128x128xbf16, #tpu.memory_space<vmem>>, vector<128x128xbf16>
    %cst_8 = arith.constant dense<0.000000e+00> : vector<104x128xf32>
    %10 = tpu.matmul %8, %9, %cst_8 {dimension_numbers = #tpu.dot_dimension_numbers<[1], [0], [0], [1], [0, 0, 1, 1], [], []>} : vector<104x128xbf16>, vector<128x128xbf16>, vector<104x128xf32> -> vector<104x128xf32>
    %c0_9 = arith.constant 0 : index
    %c0_10 = arith.constant 0 : index
    %11 = vector.load %arg5[%c0_9, %c0_10] : memref<1x128xf32, #tpu.memory_space<vmem>>, vector<1x128xf32>
    %12 = vector.broadcast %11 : vector<1x128xf32> to vector<104x128xf32>
    %13 = arith.addf %10, %12 : vector<104x128xf32>
    %14 = arith.truncf %13 : vector<104x128xf32> to vector<104x128xbf16>
    %c0_11 = arith.constant 0 : index
    %c0_12 = arith.constant 0 : index
    %15 = vector.load %arg6[%c0_11, %c0_12] : memref<128x128xbf16, #tpu.memory_space<vmem>>, vector<128x128xbf16>
    %cst_13 = arith.constant dense<0.000000e+00> : vector<104x128xf32>
    %16 = tpu.matmul %14, %15, %cst_13 {dimension_numbers = #tpu.dot_dimension_numbers<[1], [0], [0], [1], [0, 0, 1, 1], [], []>} : vector<104x128xbf16>, vector<128x128xbf16>, vector<104x128xf32> -> vector<104x128xf32>
    %c0_14 = arith.constant 0 : index
    %c0_15 = arith.constant 0 : index
    %17 = vector.load %arg7[%c0_14, %c0_15] : memref<1x128xf32, #tpu.memory_space<vmem>>, vector<1x128xf32>
    %18 = vector.broadcast %17 : vector<1x128xf32> to vector<104x128xf32>
    %19 = arith.addf %16, %18 : vector<104x128xf32>
    %cst_16 = arith.constant dense<0xFF800000> : vector<104xf32>
    %20 = vector.multi_reduction <maximumf>, %19, %cst_16 [1] : vector<104x128xf32> to vector<104xf32>
    %21 = vector.shape_cast %20 : vector<104xf32> to vector<104x1xf32>
    %22 = vector.broadcast %21 : vector<104x1xf32> to vector<104x128xf32>
    %23 = arith.subf %19, %22 : vector<104x128xf32>
    %24 = math.exp %23 : vector<104x128xf32>
    %cst_17 = arith.constant dense<0.000000e+00> : vector<104xf32>
    %25 = vector.multi_reduction <add>, %24, %cst_17 [1] : vector<104x128xf32> to vector<104xf32>
    %26 = vector.shape_cast %25 : vector<104xf32> to vector<104x1xf32>
    %27 = tpu.reciprocal %26 {approx = true} : vector<104x1xf32> -> vector<104x1xf32>
    %28 = vector.broadcast %27 : vector<104x1xf32> to vector<104x128xf32>
    %29 = arith.mulf %24, %28 : vector<104x128xf32>
    %30 = arith.truncf %29 : vector<104x128xf32> to vector<104x128xbf16>
    %c0_18 = arith.constant 0 : index
    %c0_19 = arith.constant 0 : index
    %31 = vector.load %arg8[%c0_18, %c0_19] : memref<104x128xbf16, #tpu.memory_space<vmem>>, vector<104x128xbf16>
    tpu.vector_store %arg8[%c0_18, %c0_19], %30 {strides = array<i32>} : memref<104x128xbf16, #tpu.memory_space<vmem>>, vector<104x128xbf16>,
    return
  }
  func.func @transform_0(%arg0: i32) -> (i32, i32) {
    %c0_i32 = arith.constant 0 : i32
    %c0_i32_0 = arith.constant 0 : i32
    return %arg0, %c0_i32 : i32, i32
  }
  func.func @transform_1(%arg0: i32) -> (i32, i32) {
    %c0_i32 = arith.constant 0 : i32
    %c0_i32_0 = arith.constant 0 : i32
    %c0_i32_1 = arith.constant 0 : i32
    return %c0_i32, %c0_i32_0 : i32, i32
  }
  func.func @transform_2(%arg0: i32) -> (i32, i32) {
    %c0_i32 = arith.constant 0 : i32
    %c0_i32_0 = arith.constant 0 : i32
    %c0_i32_1 = arith.constant 0 : i32
    return %c0_i32, %c0_i32_0 : i32, i32
  }
  func.func @transform_3(%arg0: i32) -> (i32, i32) {
    %c0_i32 = arith.constant 0 : i32
    %c0_i32_0 = arith.constant 0 : i32
    %c0_i32_1 = arith.constant 0 : i32
    return %c0_i32, %c0_i32_0 : i32, i32
  }
  func.func @transform_4(%arg0: i32) -> (i32, i32) {
    %c0_i32 = arith.constant 0 : i32
    %c0_i32_0 = arith.constant 0 : i32
    %c0_i32_1 = arith.constant 0 : i32
    return %c0_i32, %c0_i32_0 : i32, i32
  }
  func.func @transform_5(%arg0: i32) -> (i32, i32) {
    %c0_i32 = arith.constant 0 : i32
    %c0_i32_0 = arith.constant 0 : i32
    %c0_i32_1 = arith.constant 0 : i32
    return %c0_i32, %c0_i32_0 : i32, i32
  }
  func.func @transform_6(%arg0: i32) -> (i32, i32) {
    %c0_i32 = arith.constant 0 : i32
    %c0_i32_0 = arith.constant 0 : i32
    %c0_i32_1 = arith.constant 0 : i32
    return %c0_i32, %c0_i32_0 : i32, i32
  }
  func.func @transform_7(%arg0: i32) -> (i32, i32) {
    %c0_i32 = arith.constant 0 : i32
    %c0_i32_0 = arith.constant 0 : i32
    return %arg0, %c0_i32 : i32, i32
  }
}

</mosaic_0001>

<bundles_post_ra>
// kernel: iris_forward.1
= control target key start
LH: loop header
LB: loop body
LE: loop exit
PB: predicated region body
PF: predicated region fallthrough
CT: control target
= control target key end

     0   :  { %s1223_s24 = smov 0   ;;  %s1424_s0 = inlined_call_operand.vmem [shape: bf16[208,128], index: 0, kind: input, shape index: {}]   ;;  %s1425_s1 = inlined_call_operand.vmem [shape: bf16[128,128], index: 1, kind: input, shape index: {}]   ;;  %s1426_s2 = inlined_call_operand.vmem [shape: f32[1,128], index: 2, kind: input, shape index: {}]   ;;  %s1427_s3 = inlined_call_operand.vmem [shape: bf16[128,128], index: 3, kind: input, shape index: {}]   ;;  %s1428_s4 = inlined_call_operand.vmem [shape: f32[1,128], index: 4, kind: input, shape index: {}]   ;;  %s1429_s5 = inlined_call_operand.vmem [shape: bf16[128,128], index: 5, kind: input, shape index: {}]   ;;  %s1430_s6 = inlined_call_operand.vmem [shape: f32[1,128], index: 6, kind: input, shape index: {}]   ;;  %s1431_s7 = inlined_call_operand.vmem [shape: bf16[208,128], index: 7, kind: output, shape index: {}]  }
   0x1 LB: > { %s894_s25 = sadd.s32 4294967295, %s1181_s24   ;;  %p898_p0 = scmp.ge.s32.totalorder %s1181_s24, 1  ;;  %s1181_s24 = sphi %s1223_s24, %s17_s24  }
   0x2   : > { %p238_p1 = scmp.lt.s32.totalorder %s1181_s24, 3 }
   0x4   : > { %p239_p2 = pnand %p898_p0, %p238_p1 }
   0x5   : > { %s270_s11 = smul.u32 (!%p239_p2), 13, %s894_s25 }
   0x6   : > { %242 = sbr.rel (%p239_p2) target bundleno = 796 (0x31c), region = 48 }
   0x7   : > { %p271_p3 = scmp.lt.s32.totalorder (!%p239_p2), %s270_s11, 25 }
   0xb   : > { %v1036_v0 = vld [vmem:[%s1425_s1 + $0x38] sm:$0xff]  ;;  %v1035_v1 = vld [vmem:[%s1425_s1 + $0x30] sm:$0xff]  ;;  %v1034_v2 = vld [vmem:[%s1425_s1 + $0x28] sm:$0xff]  ;;  %s1433_s11 = smov (!%p271_p3, %s270_s11), 25 }
   0xc   : > { %403 = vmatpush.bf16.msra.mxu0 %v1036_v0  ;;  %1088 = vmatpush.bf16.msra.mxu3 %v1036_v0  ;;  %v1033_v3 = vld [vmem:[%s1425_s1 + $0x20] sm:$0xff]  ;;  %v1032_v4 = vld [vmem:[%s1425_s1 + $0x18] sm:$0xff]  ;;  %v1031_v5 = vld [vmem:[%s1425_s1 + $0x10] sm:$0xff]  ;;  %s899_s18 = sshll.u32 %s1433_s11, 2 }
   0xd   : > { %v1030_v6 = vld [vmem:[%s1425_s1 + $0x8] sm:$0xff]  ;;  %v1029_v7 = vld [vmem:[%s1425_s1] sm:$0xff]  ;;  %s274_s23 = scalar_lea.vmem %s1424_s0, %s899_s18  ;;  %v1044_v13 = vld [vmem:[%s1427_s3 + $0x38] sm:$0xff]  ;;  %s1401_s25 = scalar_lea.vmem %s1431_s7, %s899_s18 }
   0xe   : > { %v1023_v8 = vld [vmem:[%s274_s23] sm:$0xff]  ;;  %v1024_v9 = vld [vmem:[%s274_s23 + $0x8] sm:$0xff]  ;;  %v1025_v10 = vld [vmem:[%s274_s23 + $0x10] sm:$0xff]  ;;  %1096 = vmatpush.bf16.msra.mxu1 %v1044_v13 }
   0xf   : > { %v1026_v11 = vld [vmem:[%s274_s23 + $0x18] sm:$0xff]  ;;  %v1027_v12 = vld [vmem:[%s274_s23 + $0x20] sm:$0xff]  ;;  %v1043_v14 = vld [vmem:[%s1427_s3 + $0x30] sm:$0xff] }
  0x10   : > { %404 = vmatpush.bf16.msra.mxu0 %v1035_v1  ;;  %1089 = vmatpush.bf16.msra.mxu3 %v1035_v1  ;;  %v1042_v15 = vld [vmem:[%s1427_s3 + $0x28] sm:$0xff]  ;;  %v1041_v16 = vld [vmem:[%s1427_s3 + $0x20] sm:$0xff]  ;;  %v294_v18 = vld [vmem:[%s274_s23 + $0x30] sm:$0xf] }
  0x11   : > { %v1028_v17 = vld [vmem:[%s274_s23 + $0x28] sm:$0xff]  ;;  %v340_v19 = vunpack.c.l.b16 %v294_v18  ;;  %v1040_v21 = vld [vmem:[%s1427_s3 + $0x18] sm:$0xff]  ;;  %v1039_v22 = vld [vmem:[%s1427_s3 + $0x10] sm:$0xff] }
  0x12   : > { %1097 = vmatpush.bf16.msra.mxu1 %v1043_v14  ;;  %v1038_v23 = vld [vmem:[%s1427_s3 + $0x8] sm:$0xff]  ;;  %v1037_v24 = vld [vmem:[%s1427_s3] sm:$0xff]  ;;  %v1052_v61 = vld [vmem:[%s1429_s5 + $0x38] sm:$0xff] }
  0x13   : > { %v347_v20 = vpack.c.b16 %v340_v19, %v340_v19  ;;  %v1290_v26 = vld [vmem:[%s1426_s2] ss:$0 sm:$0xff]  ;;  %v1051_v63 = vld [vmem:[%s1429_s5 + $0x30] sm:$0xff]  ;;  %1104 = vmatpush.bf16.msra.mxu2 %v1052_v61  ;;  %v1050_v0 = vld [vmem:[%s1429_s5 + $0x28] sm:$0xff] }
  0x14   : > { %405 = vmatpush.bf16.msra.mxu0 %v1034_v2  ;;  %1090 = vmatpush.bf16.msra.mxu3 %v1034_v2  ;;  %v1121_v18 = vld [vmem:[%s1428_s4] ss:$0 sm:$0xff] }
  0x16   : > { %1098 = vmatpush.bf16.msra.mxu1 %v1042_v15 }
  0x17   : > { %1105 = vmatpush.bf16.msra.mxu2 %v1051_v63 }
  0x18   : > { %406 = vmatpush.bf16.msra.mxu0 %v1033_v3  ;;  %1091 = vmatpush.bf16.msra.mxu3 %v1033_v3 }
  0x1a   : > { %1099 = vmatpush.bf16.msra.mxu1 %v1041_v16 }
  0x1b   : > { %1106 = vmatpush.bf16.msra.mxu2 %v1050_v0 }
  0x1c   : > { %407 = vmatpush.bf16.msra.mxu0 %v1032_v4  ;;  %1092 = vmatpush.bf16.msra.mxu3 %v1032_v4  ;;  %v1049_v4 = vld [vmem:[%s1429_s5 + $0x20] sm:$0xff] }
  0x1e   : > { %1100 = vmatpush.bf16.msra.mxu1 %v1040_v21 }
  0x1f   : > { %1107 = vmatpush.bf16.msra.mxu2 %v1049_v4 }
  0x20   : > { %408 = vmatpush.bf16.msra.mxu0 %v1031_v5  ;;  %1093 = vmatpush.bf16.msra.mxu3 %v1031_v5 }
  0x22   : > { %1101 = vmatpush.bf16.msra.mxu1 %v1039_v22 }
  0x24   : > { %409 = vmatpush.bf16.msra.mxu0 %v1030_v6  ;;  %1094 = vmatpush.bf16.msra.mxu3 %v1030_v6 }
  0x26   : > { %1102 = vmatpush.bf16.msra.mxu1 %v1038_v23 }
  0x28   : > { %410 = vmatpush.bf16.msra.mxu0 %v1029_v7  ;;  %1095 = vmatpush.bf16.msra.mxu3 %v1029_v7 }
  0x2a   : > { %1103 = vmatpush.bf16.msra.mxu1 %v1037_v24 }
  0x2b   : > { %411 = vmatmul.bf16.vlgmr.msra.gmra.mxu0 %v1023_v8  ;;  %416 = vmatmul.bf16.vlgmr.msra.gmra.mxu3 %v1024_v9  ;;  %v1048_v8 = vld [vmem:[%s1429_s5 + $0x18] sm:$0xff] }
  0x2c   : > { %534 = vmatpush.bf16.msrb.mxu0 %v1044_v13  ;;  %1108 = vmatpush.bf16.msra.mxu2 %v1048_v8 }
  0x30   : > { %535 = vmatpush.bf16.msrb.mxu0 %v1043_v14  ;;  %v1047_v14 = vld [vmem:[%s1429_s5 + $0x10] sm:$0xff] }
  0x31   : > { %1109 = vmatpush.bf16.msra.mxu2 %v1047_v14 }
  0x34   : > { %536 = vmatpush.bf16.msrb.mxu0 %v1042_v15  ;;  %v1046_v15 = vld [vmem:[%s1429_s5 + $0x8] sm:$0xff] }
  0x35   : > { %1110 = vmatpush.bf16.msra.mxu2 %v1046_v15 }
  0x38   : > { %537 = vmatpush.bf16.msrb.mxu0 %v1041_v16  ;;  %v1045_v16 = vld [vmem:[%s1429_s5] sm:$0xff] }
  0x39   : > { %1111 = vmatpush.bf16.msra.mxu2 %v1045_v16 }
  0x3b   : > { %421 = vmatmul.bf16.gmra.mxu3 %v1025_v10 }
  0x3c   : > { %538 = vmatpush.bf16.msrb.mxu0 %v1040_v21 }
  0x40   : > { %539 = vmatpush.bf16.msrb.mxu0 %v1039_v22 }
  0x44   : > { %540 = vmatpush.bf16.msrb.mxu0 %v1038_v23 }
  0x48   : > { %541 = vmatpush.bf16.msrb.mxu0 %v1037_v24 }
  0x4b   : > { %426 = vmatmul.bf16.gmra.mxu3 %v1026_v11 }
  0x4c   : > { %652 = vmatpush.bf16.msra.mxu0 %v1052_v61 }
  0x50   : > { %653 = vmatpush.bf16.msra.mxu0 %v1051_v63 }
  0x54   : > { %654 = vmatpush.bf16.msra.mxu0 %v1050_v0 }
  0x58   : > { %655 = vmatpush.bf16.msra.mxu0 %v1049_v4 }
  0x5b   : > { %431 = vmatmul.bf16.gmra.mxu3 %v1027_v12 }
  0x5c   : > { %656 = vmatpush.bf16.msra.mxu0 %v1048_v8 }
  0x60   : > { %657 = vmatpush.bf16.msra.mxu0 %v1047_v14 }
  0x64   : > { %658 = vmatpush.bf16.msra.mxu0 %v1046_v15 }
  0x68   : > { %659 = vmatpush.bf16.msra.mxu0 %v1045_v16 }
  0x6b   : > { %436 = vmatmul.bf16.gmra.mxu3 %v1028_v17 }
  0x7b   : > { %441 = vmatmul.bf16.gmra.mxu3 %v347_v20 }
  0xa8   : > { %v412_v25 = vpop.f32.mrf.mxu0 }
  0xa9   : > { %v413_v27 = vadd.f32 %v1290_v26, %v412_v25 }
  0xab   : > { %v446_v30 = vmax.f32 %v413_v27, 0.0 }
  0xae   : > { %v417_v28 = vpop.f32.mrf.mxu3 }
  0xaf   : > { %v418_v33 = vadd.f32 %v1290_v26, %v417_v28 }
  0xb0   : > { %v414_v29 = vpop.f32.mrf.mxu0 }
  0xb1   : > { %v415_v31 = vadd.f32 %v1290_v26, %v414_v29  ;;  %v448_v37 = vmax.f32 %v418_v33, 0.0 }
  0xb3   : > { %v447_v32 = vmax.f32 %v415_v31, 0.0 }
  0xb5   : > { %v459_v34 = vpack.c.bf16 %v447_v32, %v446_v30 }
  0xb6   : > { %v419_v35 = vpop.f32.mrf.mxu3 }
  0xb7   : > { %v420_v36 = vadd.f32 %v1290_v26, %v419_v35  ;;  %542 = vmatmul.bf16.vlgmr.msrb.gmra.mxu0 %v459_v34 }
  0xb9   : > { %v449_v38 = vmax.f32 %v420_v36, 0.0 }
  0xbb   : > { %v460_v39 = vpack.c.bf16 %v449_v38, %v448_v37 }
  0xbd   : > { %547 = vmatmul.bf16.vlgmr.msra.gmra.mxu1 %v460_v39 }
  0xbe   : > { %v422_v40 = vpop.f32.mrf.mxu3 }
  0xbf   : > { %v423_v41 = vadd.f32 %v1290_v26, %v422_v40 }
  0xc1   : > { %v450_v44 = vmax.f32 %v423_v41, 0.0 }
  0xc6   : > { %v424_v42 = vpop.f32.mrf.mxu3 }
  0xc7   : > { %v425_v43 = vadd.f32 %v1290_v26, %v424_v42 }
  0xc9   : > { %v451_v45 = vmax.f32 %v425_v43, 0.0 }
  0xcb   : > { %v461_v46 = vpack.c.bf16 %v451_v45, %v450_v44 }
  0xcd   : > { %552 = vmatmul.bf16.gmra.mxu1 %v461_v46 }
  0xce   : > { %v427_v47 = vpop.f32.mrf.mxu3 }
  0xcf   : > { %v428_v48 = vadd.f32 %v1290_v26, %v427_v47 }
  0xd1   : > { %v452_v51 = vmax.f32 %v428_v48, 0.0 }
  0xd6   : > { %v429_v49 = vpop.f32.mrf.mxu3 }
  0xd7   : > { %v430_v50 = vadd.f32 %v1290_v26, %v429_v49 }
  0xd9   : > { %v453_v52 = vmax.f32 %v430_v50, 0.0 }
  0xdb   : > { %v462_v53 = vpack.c.bf16 %v453_v52, %v452_v51  ;;  %v1122_v52 = vld [vmem:[%s1430_s6] ss:$0 sm:$0xff] }
  0xdd   : > { %557 = vmatmul.bf16.gmra.mxu1 %v462_v53 }
  0xde   : > { %v432_v54 = vpop.f32.mrf.mxu3 }
  0xdf   : > { %v433_v55 = vadd.f32 %v1290_v26, %v432_v54 }
  0xe1   : > { %v454_v58 = vmax.f32 %v433_v55, 0.0 }
  0xe6   : > { %v434_v56 = vpop.f32.mrf.mxu3 }
  0xe7   : > { %v435_v57 = vadd.f32 %v1290_v26, %v434_v56 }
  0xe9   : > { %v455_v59 = vmax.f32 %v435_v57, 0.0 }
  0xeb   : > { %v463_v60 = vpack.c.bf16 %v455_v59, %v454_v58 }
  0xed   : > { %562 = vmatmul.bf16.gmra.mxu1 %v463_v60 }
  0xee   : > { %v437_v62 = vpop.f32.mrf.mxu3 }
  0xef   : > { %v438_v1 = vadd.f32 %v1290_v26, %v437_v62 }
  0xf1   : > { %v456_v5 = vmax.f32 %v438_v1, 0.0 }
  0xf6   : > { %v439_v2 = vpop.f32.mrf.mxu3 }
  0xf7   : > { %v440_v3 = vadd.f32 %v1290_v26, %v439_v2 }
  0xf9   : > { %v457_v6 = vmax.f32 %v440_v3, 0.0 }
  0xfb   : > { %v464_v7 = vpack.c.bf16 %v457_v6, %v456_v5 }
  0xfd   : > { %567 = vmatmul.bf16.gmra.mxu1 %v464_v7 }
  0xfe   : > { %v442_v9 = vpop.f32.mrf.mxu3 }
  0xff   : > { %v443_v10 = vadd.f32 %v1290_v26, %v442_v9 }
 0x101   : > { %v458_v11 = vmax.f32 %v443_v10, 0.0 }
 0x103   : > { %v465_v13 = vpack.c.bf16 %v458_v11, %v458_v11 }
 0x106   : > { %v444_v12 = vpop.f32.mrf.mxu3 }
 0x10d   : > { %572 = vmatmul.bf16.gmra.mxu1 %v465_v13 }
 0x134   : > { %v543_v17 = vpop.f32.mrf.mxu0 }
 0x135   : > { %v544_v20 = vadd.f32 %v1121_v18, %v543_v17 }
 0x13a   : > { %v548_v19 = vpop.f32.mrf.mxu1 }
 0x13b   : > { %v549_v25 = vadd.f32 %v1121_v18, %v548_v19 }
 0x13c   : > { %v545_v21 = vpop.f32.mrf.mxu0 }
 0x13d   : > { %v546_v22 = vadd.f32 %v1121_v18, %v545_v21 }
 0x13f   : > { %v577_v23 = vpack.c.bf16 %v546_v22, %v544_v20 }
 0x141   : > { %660 = vmatmul.bf16.vlgmr.msra.gmra.mxu0 %v577_v23 }
 0x142   : > { %v550_v24 = vpop.f32.mrf.mxu1 }
 0x143   : > { %v551_v26 = vadd.f32 %v1121_v18, %v550_v24 }
 0x145   : > { %v578_v27 = vpack.c.bf16 %v551_v26, %v549_v25 }
 0x147   : > { %665 = vmatmul.bf16.vlgmr.msra.gmra.mxu2 %v578_v27 }
 0x14a   : > { %v553_v28 = vpop.f32.mrf.mxu1 }
 0x14b   : > { %v554_v30 = vadd.f32 %v1121_v18, %v553_v28 }
 0x152   : > { %v555_v29 = vpop.f32.mrf.mxu1 }
 0x153   : > { %v556_v31 = vadd.f32 %v1121_v18, %v555_v29 }
 0x155   : > { %v579_v32 = vpack.c.bf16 %v556_v31, %v554_v30 }
 0x157   : > { %670 = vmatmul.bf16.gmra.mxu2 %v579_v32 }
 0x15a   : > { %v558_v33 = vpop.f32.mrf.mxu1 }
 0x15b   : > { %v559_v35 = vadd.f32 %v1121_v18, %v558_v33 }
 0x162   : > { %v560_v34 = vpop.f32.mrf.mxu1 }
 0x163   : > { %v561_v36 = vadd.f32 %v1121_v18, %v560_v34 }
 0x165   : > { %v580_v37 = vpack.c.bf16 %v561_v36, %v559_v35 }
 0x167   : > { %675 = vmatmul.bf16.gmra.mxu2 %v580_v37 }
 0x16a   : > { %v563_v38 = vpop.f32.mrf.mxu1 }
 0x16b   : > { %v564_v40 = vadd.f32 %v1121_v18, %v563_v38 }
 0x172   : > { %v565_v39 = vpop.f32.mrf.mxu1 }
 0x173   : > { %v566_v41 = vadd.f32 %v1121_v18, %v565_v39 }
 0x175   : > { %v581_v42 = vpack.c.bf16 %v566_v41, %v564_v40 }
 0x177   : > { %680 = vmatmul.bf16.gmra.mxu2 %v581_v42 }
 0x17a   : > { %v568_v43 = vpop.f32.mrf.mxu1 }
 0x17b   : > { %v569_v45 = vadd.f32 %v1121_v18, %v568_v43 }
 0x182   : > { %v570_v44 = vpop.f32.mrf.mxu1 }
 0x183   : > { %v571_v46 = vadd.f32 %v1121_v18, %v570_v44 }
 0x185   : > { %v582_v47 = vpack.c.bf16 %v571_v46, %v569_v45 }
 0x187   : > { %685 = vmatmul.bf16.gmra.mxu2 %v582_v47 }
 0x18a   : > { %v573_v48 = vpop.f32.mrf.mxu1 }
 0x18b   : > { %v574_v49 = vadd.f32 %v1121_v18, %v573_v48 }
 0x18d   : > { %v583_v51 = vpack.c.bf16 %v574_v49, %v574_v49 }
 0x192   : > { %v575_v50 = vpop.f32.mrf.mxu1 }
 0x197   : > { %690 = vmatmul.bf16.gmra.mxu2 %v583_v51 }
 0x1be   : > { %v661_v53 = vpop.f32.mrf.mxu0 }
 0x1bf   : > { %v662_v54 = vadd.f32 %v1122_v52, %v661_v53 }
 0x1c1   : > { %695 = vmax.xlane.f32.xlu0 %v662_v54 }
 0x1c6   : > { %v663_v55 = vpop.f32.mrf.mxu0 }
 0x1c7   : > { %v664_v56 = vadd.f32 %v1122_v52, %v663_v55 }
 0x1c9   : > { %697 = vmax.xlane.f32.xlu0 %v664_v56 }
 0x1ca   : > { %v666_v57 = vpop.f32.mrf.mxu2 }
 0x1cb   : > { %v667_v58 = vadd.f32 %v1122_v52, %v666_v57 }
 0x1cd   : > { %699 = vmax.xlane.f32.xlu1 %v667_v58 }
 0x1d2   : > { %v668_v59 = vpop.f32.mrf.mxu2 }
 0x1d3   : > { %v669_v60 = vadd.f32 %v1122_v52, %v668_v59 }
 0x1d5   : > { %701 = vmax.xlane.f32.xlu1 %v669_v60 }
 0x1da   : > { %v671_v61 = vpop.f32.mrf.mxu2 }
 0x1db   : > { %v672_v62 = vadd.f32 %v1122_v52, %v671_v61 }
 0x1dd   : > { %703 = vmax.xlane.f32.xlu2 %v672_v62 }
 0x1e2   : > { %v673_v63 = vpop.f32.mrf.mxu2 }
 0x1e3   : > { %v674_v0 = vadd.f32 %v1122_v52, %v673_v63 }
 0x1e5   : > { %705 = vmax.xlane.f32.xlu2 %v674_v0 }
 0x1ea   : > { %v676_v1 = vpop.f32.mrf.mxu2 }
 0x1eb   : > { %v677_v2 = vadd.f32 %v1122_v52, %v676_v1 }
 0x1ed   : > { %707 = vmax.xlane.f32.xlu0 %v677_v2 }
 0x1f2   : > { %v678_v3 = vpop.f32.mrf.mxu2 }
 0x1f3   : > { %v679_v4 = vadd.f32 %v1122_v52, %v678_v3 }
 0x1f5   : > { %709 = vmax.xlane.f32.xlu1 %v679_v4 }
 0x1fa   : > { %v681_v5 = vpop.f32.mrf.mxu2 }
 0x1fb   : > { %v1335_v6 = vadd.f32 %v1122_v52, %v681_v5 }
 0x1fd   : > { %711 = vmax.xlane.f32.xlu2 %v1335_v6 }
 0x202   : > { %v683_v7 = vpop.f32.mrf.mxu2 }
 0x203   : > { %v1338_v8 = vadd.f32 %v1122_v52, %v683_v7 }
 0x205   : > { %713 = vmax.xlane.f32.xlu0 %v1338_v8 }
 0x20a   : > { %v686_v9 = vpop.f32.mrf.mxu2 }
 0x20b   : > { %v1341_v10 = vadd.f32 %v1122_v52, %v686_v9 }
 0x20d   : > { %715 = vmax.xlane.f32.xlu1 %v1341_v10 }
 0x212   : > { %v688_v11 = vpop.f32.mrf.mxu2 }
 0x213   : > { %v1344_v12 = vadd.f32 %v1122_v52, %v688_v11 }
 0x215   : > { %717 = vmax.xlane.f32.xlu2 %v1344_v12 }
 0x21a   : > { %v691_v13 = vpop.f32.mrf.mxu2 }
 0x21b   : > { %v1347_v14 = vadd.f32 %v1122_v52, %v691_v13 }
 0x21d   : > { %719 = vmax.xlane.f32.xlu0 %v1347_v14 }
 0x222   : > { %v693_v15 = vpop.f32.mrf.mxu2 }
 0x234   : > { %v696_v16 = vpop.xlane.xlu0 %695 }
 0x235   : > { %v721_v17 = vsub.f32 %v662_v54, %v696_v16 }
 0x237   : > { %v734_v18 = vmul.f32 1.442695, %v721_v17 }
 0x239   : > { %1123 = vpow2.f32 %v734_v18 }
 0x23c   : > { %v698_v19 = vpop.xlane.xlu0 %697 }
 0x23d   : > { %v722_v20 = vsub.f32 %v664_v56, %v698_v19 }
 0x23f   : > { %v1350_v21 = vpop.eup %1123  ;;  %v736_v22 = vmul.f32 1.442695, %v722_v20 }
 0x240   : > { %v700_v23 = vpop.xlane.xlu1 %699  ;;  %760 = vadd.xlane.f32.xlu1 %v1350_v21 }
 0x241   : > { %1125 = vpow2.f32 %v736_v22  ;;  %v723_v24 = vsub.f32 %v667_v58, %v700_v23 }
 0x243   : > { %v738_v25 = vmul.f32 1.442695, %v723_v24 }
 0x245   : > { %1127 = vpow2.f32 %v738_v25 }
 0x247   : > { %v1353_v26 = vpop.eup %1125 }
 0x248   : > { %v702_v27 = vpop.xlane.xlu1 %701  ;;  %762 = vadd.xlane.f32.xlu2 %v1353_v26 }
 0x249   : > { %v724_v28 = vsub.f32 %v669_v60, %v702_v27 }
 0x24b   : > { %v1356_v29 = vpop.eup %1127  ;;  %v740_v30 = vmul.f32 1.442695, %v724_v28 }
 0x24c   : > { %764 = vadd.xlane.f32.xlu0 %v1356_v29 }
 0x24d   : > { %1129 = vpow2.f32 %v740_v30 }
 0x250   : > { %v704_v31 = vpop.xlane.xlu2 %703 }
 0x251   : > { %v725_v32 = vsub.f32 %v672_v62, %v704_v31 }
 0x253   : > { %v1359_v33 = vpop.eup %1129  ;;  %v742_v34 = vmul.f32 1.442695, %v725_v32 }
 0x254   : > { %766 = vadd.xlane.f32.xlu1 %v1359_v33 }
 0x255   : > { %1131 = vpow2.f32 %v742_v34 }
 0x258   : > { %v706_v35 = vpop.xlane.xlu2 %705 }
 0x259   : > { %v726_v36 = vsub.f32 %v674_v0, %v706_v35 }
 0x25b   : > { %v1362_v37 = vpop.eup %1131  ;;  %v744_v38 = vmul.f32 1.442695, %v726_v36 }
 0x25c   : > { %768 = vadd.xlane.f32.xlu2 %v1362_v37 }
 0x25d   : > { %1133 = vpow2.f32 %v744_v38 }
 0x260   : > { %v708_v39 = vpop.xlane.xlu0 %707 }
 0x261   : > { %v727_v40 = vsub.f32 %v677_v2, %v708_v39 }
 0x263   : > { %v1365_v41 = vpop.eup %1133  ;;  %v746_v42 = vmul.f32 1.442695, %v727_v40 }
 0x264   : > { %770 = vadd.xlane.f32.xlu0 %v1365_v41 }
 0x265   : > { %1135 = vpow2.f32 %v746_v42 }
 0x268   : > { %v710_v43 = vpop.xlane.xlu1 %709 }
 0x269   : > { %v728_v44 = vsub.f32 %v679_v4, %v710_v43 }
 0x26b   : > { %v1368_v45 = vpop.eup %1135  ;;  %v748_v46 = vmul.f32 1.442695, %v728_v44 }
 0x26c   : > { %772 = vadd.xlane.f32.xlu1 %v1368_v45 }
 0x26d   : > { %1137 = vpow2.f32 %v748_v46 }
 0x270   : > { %v712_v47 = vpop.xlane.xlu2 %711 }
 0x271   : > { %v729_v48 = vsub.f32 %v1335_v6, %v712_v47 }
 0x273   : > { %v1372_v49 = vpop.eup %1137  ;;  %v750_v50 = vmul.f32 1.442695, %v729_v48 }
 0x274   : > { %774 = vadd.xlane.f32.xlu2 %v1372_v49 }
 0x275   : > { %1139 = vpow2.f32 %v750_v50 }
 0x278   : > { %v714_v51 = vpop.xlane.xlu0 %713 }
 0x279   : > { %v730_v52 = vsub.f32 %v1338_v8, %v714_v51 }
 0x27b   : > { %v1376_v53 = vpop.eup %1139  ;;  %v752_v54 = vmul.f32 1.442695, %v730_v52 }
 0x27c   : > { %776 = vadd.xlane.f32.xlu0 %v1376_v53 }
 0x27d   : > { %1141 = vpow2.f32 %v752_v54 }
 0x280   : > { %v716_v55 = vpop.xlane.xlu1 %715 }
 0x281   : > { %v731_v56 = vsub.f32 %v1341_v10, %v716_v55 }
 0x283   : > { %v1380_v57 = vpop.eup %1141  ;;  %v754_v58 = vmul.f32 1.442695, %v731_v56 }
 0x284   : > { %778 = vadd.xlane.f32.xlu1 %v1380_v57 }
 0x285   : > { %1143 = vpow2.f32 %v754_v58 }
 0x288   : > { %v718_v59 = vpop.xlane.xlu2 %717 }
 0x289   : > { %v732_v60 = vsub.f32 %v1344_v12, %v718_v59 }
 0x28b   : > { %v1384_v61 = vpop.eup %1143  ;;  %v756_v62 = vmul.f32 1.442695, %v732_v60 }
 0x28c   : > { %780 = vadd.xlane.f32.xlu2 %v1384_v61 }
 0x28d   : > { %1145 = vpow2.f32 %v756_v62 }
 0x290   : > { %v720_v63 = vpop.xlane.xlu0 %719 }
 0x291   : > { %v733_v0 = vsub.f32 %v1347_v14, %v720_v63 }
 0x293   : > { %v1388_v1 = vpop.eup %1145  ;;  %v758_v2 = vmul.f32 1.442695, %v733_v0 }
 0x294   : > { %782 = vadd.xlane.f32.xlu0 %v1388_v1 }
 0x295   : > { %1147 = vpow2.f32 %v758_v2 }
 0x29b   : > { %v1391_v3 = vpop.eup %1147 }
 0x29c   : > { %784 = vadd.xlane.f32.xlu1 %v1391_v3 }
 0x2b3   : > { %v761_v4 = vpop.xlane.xlu1 %760 }
 0x2b4   : > { %1149 = vrcp.f32 %v761_v4 }
 0x2ba   : > { %v1150_v6 = vpop.eup %1149 }
 0x2bb   : > { %v763_v5 = vpop.xlane.xlu2 %762  ;;  %v799_v8 = vmul.f32 %v1150_v6, %v1350_v21 }
 0x2bc   : > { %1151 = vrcp.f32 %v763_v5 }
 0x2bf   : > { %v765_v10 = vpop.xlane.xlu0 %764 }
 0x2c0   : > { %1153 = vrcp.f32 %v765_v10 }
 0x2c2   : > { %v1152_v7 = vpop.eup %1151 }
 0x2c3   : > { %v800_v9 = vmul.f32 %v1152_v7, %v1353_v26 }
 0x2c5   : > { %v1056_v11 = vpack.c.bf16 %v800_v9, %v799_v8 }
 0x2c6   : > { %v1154_v13 = vpop.eup %1153 }
 0x2c7   : > { %1057 = vst [vmem:[%s1401_s25] sm:$0xff] %v1056_v11   ;;  %v767_v12 = vpop.xlane.xlu1 %766  ;;  %v801_v15 = vmul.f32 %v1154_v13, %v1356_v29 }
 0x2c8   : > { %1155 = vrcp.f32 %v767_v12 }
 0x2ce   : > { %v1156_v14 = vpop.eup %1155 }
 0x2cf   : > { %v802_v16 = vmul.f32 %v1156_v14, %v1359_v33  ;;  %v769_v18 = vpop.xlane.xlu2 %768 }
 0x2d0   : > { %1157 = vrcp.f32 %v769_v18 }
 0x2d1   : > { %v1061_v17 = vpack.c.bf16 %v802_v16, %v801_v15 }
 0x2d3   : > { %1083 = vst [vmem:[%s1401_s25 + $0x8] sm:$0xff] %v1061_v17  }
 0x2d6   : > { %v1158_v20 = vpop.eup %1157 }
 0x2d7   : > { %v771_v19 = vpop.xlane.xlu0 %770  ;;  %v803_v22 = vmul.f32 %v1158_v20, %v1362_v37 }
 0x2d8   : > { %1159 = vrcp.f32 %v771_v19 }
 0x2de   : > { %v1160_v21 = vpop.eup %1159 }
 0x2df   : > { %v804_v23 = vmul.f32 %v1160_v21, %v1365_v41  ;;  %v773_v25 = vpop.xlane.xlu1 %772 }
 0x2e0   : > { %1161 = vrcp.f32 %v773_v25 }
 0x2e1   : > { %v1066_v24 = vpack.c.bf16 %v804_v23, %v803_v22 }
 0x2e3   : > { %1084 = vst [vmem:[%s1401_s25 + $0x10] sm:$0xff] %v1066_v24  }
 0x2e6   : > { %v1162_v27 = vpop.eup %1161 }
 0x2e7   : > { %v775_v26 = vpop.xlane.xlu2 %774  ;;  %v805_v29 = vmul.f32 %v1162_v27, %v1368_v45 }
 0x2e8   : > { %1163 = vrcp.f32 %v775_v26 }
 0x2ee   : > { %v1164_v28 = vpop.eup %1163 }
 0x2ef   : > { %v806_v30 = vmul.f32 %v1164_v28, %v1372_v49  ;;  %v777_v32 = vpop.xlane.xlu0 %776 }
 0x2f0   : > { %1165 = vrcp.f32 %v777_v32 }
 0x2f1   : > { %v1071_v31 = vpack.c.bf16 %v806_v30, %v805_v29 }
 0x2f3   : > { %1085 = vst [vmem:[%s1401_s25 + $0x18] sm:$0xff] %v1071_v31  }
 0x2f6   : > { %v1166_v34 = vpop.eup %1165 }
 0x2f7   : > { %v779_v33 = vpop.xlane.xlu1 %778  ;;  %v807_v36 = vmul.f32 %v1166_v34, %v1376_v53 }
 0x2f8   : > { %1167 = vrcp.f32 %v779_v33 }
 0x2fe   : > { %v1168_v35 = vpop.eup %1167 }
 0x2ff   : > { %v808_v37 = vmul.f32 %v1168_v35, %v1380_v57  ;;  %v781_v39 = vpop.xlane.xlu2 %780 }
 0x300   : > { %1169 = vrcp.f32 %v781_v39 }
 0x301   : > { %v1076_v38 = vpack.c.bf16 %v808_v37, %v807_v36 }
 0x303   : > { %1086 = vst [vmem:[%s1401_s25 + $0x20] sm:$0xff] %v1076_v38  }
 0x306   : > { %v1170_v41 = vpop.eup %1169 }
 0x307   : > { %v783_v40 = vpop.xlane.xlu0 %782  ;;  %v809_v43 = vmul.f32 %v1170_v41, %v1384_v61 }
 0x308   : > { %1171 = vrcp.f32 %v783_v40 }
 0x30e   : > { %v1172_v42 = vpop.eup %1171 }
 0x30f   : > { %v810_v44 = vmul.f32 %v1172_v42, %v1388_v1  ;;  %v785_v45 = vpop.xlane.xlu1 %784 }
 0x310   : > { %1173 = vrcp.f32 %v785_v45 }
 0x311   : > { %v1081_v46 = vpack.c.bf16 %v810_v44, %v809_v43 }
 0x313   : > { %1087 = vst [vmem:[%s1401_s25 + $0x28] sm:$0xff] %v1081_v46  }
 0x316   : > { %v1174_v47 = vpop.eup %1173 }
 0x317   : > { %v811_v48 = vmul.f32 %v1174_v47, %v1391_v3 }
 0x319   : > { %v824_v49 = vpack.c.bf16 %v811_v48, %v811_v48 }
 0x31b   : > { %837 = vst [vmem:[%s1401_s25 + $0x30] sm:$0xf] %v824_v49 }
 0x31c PF: > { %s17_s24 = sadd.s32 1, %s1181_s24  }
 0x31d   : > { %p14_p4 = scmp.ge.s32.totalorder %s17_s24, 4  }
 0x31f   :  { %16 = sbr.rel (!%p14_p4) target bundleno = 1 (0x1), region = 78 }

</bundles_post_ra>
